<compile_context>
chip_gen: v7x
topology: tpu7x:2x2x1
jax: 0.10.0
libtpu: 0.0.40
codegen_flags: <defaults>
</compile_context>

<pallas_src>
import math

import jax
import jax.numpy as jnp
from jax.experimental import pallas as pl
from jax.experimental.pallas import tpu as pltpu

# Pooling hyper-parameters (MaxPool2d(kernel_size=3, ceil_mode=True)).
K = 3          # kernel size
S = 3          # stride (defaults to kernel_size in PyTorch)
H = W = 5      # spatial size fixed by the reshape(-1, 1, 5, 5)

# ceil_mode output size: ceil((H - K) / S) + 1
OH = math.ceil((H - K) / S) + 1
OW = math.ceil((W - K) / S) + 1

LANES = 128
MIN_TILE_LANES = 1024       # 8 vreg-rows: keeps (GT, 128) blocks (8,128)-aligned
MAX_TILE_LANES = 32768      # ~3.1 MiB input/step; ~8 MiB double-buffered VMEM
                            # (under v5e's 16 MiB default scoped-VMEM limit;
                            #  can be raised to 65536 on v6e/v7x together with
                            #  pltpu.CompilerParams(vmem_limit_bytes=...)).


def _round_up(x, m):
    return ((x + m - 1) // m) * m


def _cdiv(a, b):
    return (a + b - 1) // b


def _window_indices():
    """Flattened (h*W + w) input indices feeding each output element.

    Windows are clipped to the input extent == PyTorch ceil_mode behaviour for
    this configuration (every window starts in-bounds; only real elements take
    part in the max).
    """
    wins = []
    for oh in range(OH):
        h0, h1 = oh * S, min(oh * S + K, H)
        for ow in range(OW):
            w0, w1 = ow * S, min(ow * S + K, W)
            wins.append([hh * W + ww
                         for hh in range(h0, h1)
                         for ww in range(w0, w1)])
    return wins


_WINDOWS = _window_indices()        # OH*OW == 4 windows; 25 indices total
# TODO(synk): if H/W/K/S are ever generalized, also drop windows that start
# entirely in the right/bottom overhang (PyTorch rule); clipping alone is only
# sufficient for this configuration.


def _tree_max(vals):
    # Balanced reduction -> short dependency chain (review item 7).
    while len(vals) > 1:
        nxt = [jnp.maximum(a, b) for a, b in zip(vals[0::2], vals[1::2])]
        if len(vals) % 2:
            nxt.append(vals[-1])
        vals = nxt
    return vals[0]


def maxpool_kernel(x_ref, o_ref):
    # x_ref: (H*W, GT, 128) VMEM tile; o_ref: (OH*OW, GT, 128) VMEM tile.
    # Batch lives on the (GT sublanes x 128 lanes) plane, so every read, every
    # maximum and every store below is a fully dense vector op.
    for p, idxs in enumerate(_WINDOWS):
        o_ref[p] = _tree_max([x_ref[i] for i in idxs])


def _choose_tiling(b):
    """Pick (padded_batch, lanes_per_step) for a logical batch of b images."""
    bt = _round_up(max(b, 1), MIN_TILE_LANES)
    nt = _cdiv(bt, MAX_TILE_LANES)
    if nt == 1 and bt >= 2 * MIN_TILE_LANES:
        nt = 2                       # >= 2 grid steps so both v7x TCs get work
    if nt > 1 and nt % 2 == 1:
        nt += 1                      # even step count shards evenly across 2 TCs
    tile_lanes = _round_up(_cdiv(bt, nt), MIN_TILE_LANES)
    bp = nt * tile_lanes
    return bp, tile_lanes


def _maxpool_pallas_3d(xt3, tile_lanes):
    """(H*W, G, 128) lanes-major input -> (OH*OW, G, 128). No relayout here."""
    hw, g, lanes = xt3.shape
    assert hw == H * W and lanes == LANES
    gt = tile_lanes // LANES
    assert g % gt == 0 and tile_lanes % MIN_TILE_LANES == 0
    return pl.pallas_call(
        maxpool_kernel,
        out_shape=jax.ShapeDtypeStruct((OH * OW, g, LANES), xt3.dtype),
        grid=(g // gt,),
        in_specs=[pl.BlockSpec((H * W, gt, LANES), lambda i: (0, i, 0))],
        out_specs=pl.BlockSpec((OH * OW, gt, LANES), lambda i: (0, i, 0)),
        compiler_params=pltpu.CompilerParams(
            dimension_semantics=("parallel",)),
    )(xt3)


def maxpool_hw_major(x_hw_b):
    """MaxPool for activations kept spatial-major: (H*W, B) -> (OH*OW, B).

    Review item 1, option (a): no input transpose at all -- only a minor-dim
    split (and lane padding) before the kernel.
    """
    hw, b = x_hw_b.shape
    assert hw == H * W
    bp, tile_lanes = _choose_tiling(b)
    if bp != b:
        x_hw_b = jnp.pad(x_hw_b, ((0, 0), (0, bp - b)))
    xt3 = x_hw_b.reshape(H * W, bp // LANES, LANES)      # minor-dim split
    out3 = _maxpool_pallas_3d(xt3, tile_lanes)
    return out3.reshape(OH * OW, bp)[:, :b]


def tudui_forward(x):
    """x: (N, C, 5, 5) float32 -> (N, C, OH, OW); MaxPool2d(k=3, ceil_mode=True)."""
    n, c, h, w = x.shape
    assert (h, w) == (H, W), "kernel is specialized for 5x5 spatial input"
    b = n * c
    bp, tile_lanes = _choose_tiling(b)

    # Single relayout: NCHW (batch-major) -> (H*W, B/128, 128) lanes-major,
    # produced directly in the 3-D shape the kernel consumes.
    # TODO(synk): callers that can keep activations (H*W, B)-major upstream
    # should use maxpool_hw_major (no transpose); alternatively try
    # pltpu.CompilerParams(allow_input_fusion=[True]) to fuse this relayout
    # into the Pallas input DMA.
    x2 = x.reshape(b, H * W)
    if bp != b:
        x2 = jnp.pad(x2, ((0, bp - b), (0, 0)))
    xt3 = jnp.transpose(x2.reshape(bp // LANES, LANES, H * W), (2, 0, 1))

    out3 = _maxpool_pallas_3d(xt3, tile_lanes)           # (4, bp//128, 128)

    # Output relayout is tiny (16 B/image).
    out = jnp.transpose(out3, (1, 2, 0)).reshape(bp, OH * OW)[:b]
    return out.reshape(n, c, OH, OW)


def _reference_maxpool(x):
    # Pure-JAX reference (ceil_mode via -inf padding then reduce_window).
    n, c, h, w = x.shape
    pad_h = (OH - 1) * S + K - h
    pad_w = (OW - 1) * S + K - w
    xp = jnp.pad(x, ((0, 0), (0, 0), (0, pad_h), (0, pad_w)),
                 constant_values=-jnp.inf)
    return jax.lax.reduce_window(
        xp, -jnp.inf, jax.lax.max,
        window_dimensions=(1, 1, K, K),
        window_strides=(1, 1, S, S),
        padding="VALID")


if __name__ == "__main__":
    key = jax.random.PRNGKey(0)

    # Small input consistent with the module's reshape(-1, 1, 5, 5).
    x_small = jax.random.normal(key, (2, 1, 5, 5), dtype=jnp.float32)
    out_small = jax.block_until_ready(tudui_forward(x_small))
    ref_small = _reference_maxpool(x_small)
    assert out_small.shape == (2, 1, OH, OW)
    assert jnp.allclose(out_small, ref_small), "Pallas maxpool mismatch (small)"

    # Larger batch: exercises lane padding and the >= 2-step (megacore) grid.
    x_big = jax.random.normal(jax.random.PRNGKey(1), (3000, 1, 5, 5),
                              dtype=jnp.float32)
    out_big = jax.block_until_ready(tudui_forward(x_big))
    ref_big = _reference_maxpool(x_big)
    assert out_big.shape == (3000, 1, OH, OW)
    assert jnp.allclose(out_big, ref_big), "Pallas maxpool mismatch (big)"

    # Spatial-major entry point (no input transpose at all).
    x_hw = x_big.reshape(3000, H * W).T
    out_hw = jax.block_until_ready(maxpool_hw_major(x_hw))
    assert jnp.allclose(out_hw.T.reshape(3000, 1, OH, OW), ref_big), \
        "Pallas maxpool mismatch (hw-major)"

    print("KERNEL_OK")
</pallas_src>

<mosaic_0001>
module attributes {stable_mosaic.version = 11 : i64} {
  func.func @maxpool_kernel(%arg0: i32, %arg1: memref<25x8x128xf32, #tpu.memory_space<vmem>>, %arg2: memref<4x8x128xf32, #tpu.memory_space<vmem>>) attributes {dimension_semantics = [#tpu.dimension_semantics<parallel>], iteration_bounds = array<i64: 1>, scalar_prefetch = 0 : i64, scratch_operands = 0 : i64, tpu.core_type = #tpu.core_type<tc>, window_params = [{transform_indices = @transform_0, window_bounds = array<i64: 25, 8, 128>}, {transform_indices = @transform_1, window_bounds = array<i64: 4, 8, 128>}]} {
    %c0 = arith.constant 0 : index
    %c0_0 = arith.constant 0 : index
    %c0_1 = arith.constant 0 : index
    %0 = vector.load %arg1[%c0, %c0_0, %c0_1] : memref<25x8x128xf32, #tpu.memory_space<vmem>>, vector<1x8x128xf32>
    %1 = vector.shape_cast %0 : vector<1x8x128xf32> to vector<8x128xf32>
    %c1 = arith.constant 1 : index
    %c0_2 = arith.constant 0 : index
    %c0_3 = arith.constant 0 : index
    %2 = vector.load %arg1[%c1, %c0_2, %c0_3] : memref<25x8x128xf32, #tpu.memory_space<vmem>>, vector<1x8x128xf32>
    %3 = vector.shape_cast %2 : vector<1x8x128xf32> to vector<8x128xf32>
    %c2 = arith.constant 2 : index
    %c0_4 = arith.constant 0 : index
    %c0_5 = arith.constant 0 : index
    %4 = vector.load %arg1[%c2, %c0_4, %c0_5] : memref<25x8x128xf32, #tpu.memory_space<vmem>>, vector<1x8x128xf32>
    %5 = vector.shape_cast %4 : vector<1x8x128xf32> to vector<8x128xf32>
    %c5 = arith.constant 5 : index
    %c0_6 = arith.constant 0 : index
    %c0_7 = arith.constant 0 : index
    %6 = vector.load %arg1[%c5, %c0_6, %c0_7] : memref<25x8x128xf32, #tpu.memory_space<vmem>>, vector<1x8x128xf32>
    %7 = vector.shape_cast %6 : vector<1x8x128xf32> to vector<8x128xf32>
    %c6 = arith.constant 6 : index
    %c0_8 = arith.constant 0 : index
    %c0_9 = arith.constant 0 : index
    %8 = vector.load %arg1[%c6, %c0_8, %c0_9] : memref<25x8x128xf32, #tpu.memory_space<vmem>>, vector<1x8x128xf32>
    %9 = vector.shape_cast %8 : vector<1x8x128xf32> to vector<8x128xf32>
    %c7 = arith.constant 7 : index
    %c0_10 = arith.constant 0 : index
    %c0_11 = arith.constant 0 : index
    %10 = vector.load %arg1[%c7, %c0_10, %c0_11] : memref<25x8x128xf32, #tpu.memory_space<vmem>>, vector<1x8x128xf32>
    %11 = vector.shape_cast %10 : vector<1x8x128xf32> to vector<8x128xf32>
    %c10 = arith.constant 10 : index
    %c0_12 = arith.constant 0 : index
    %c0_13 = arith.constant 0 : index
    %12 = vector.load %arg1[%c10, %c0_12, %c0_13] : memref<25x8x128xf32, #tpu.memory_space<vmem>>, vector<1x8x128xf32>
    %13 = vector.shape_cast %12 : vector<1x8x128xf32> to vector<8x128xf32>
    %c11 = arith.constant 11 : index
    %c0_14 = arith.constant 0 : index
    %c0_15 = arith.constant 0 : index
    %14 = vector.load %arg1[%c11, %c0_14, %c0_15] : memref<25x8x128xf32, #tpu.memory_space<vmem>>, vector<1x8x128xf32>
    %15 = vector.shape_cast %14 : vector<1x8x128xf32> to vector<8x128xf32>
    %c12 = arith.constant 12 : index
    %c0_16 = arith.constant 0 : index
    %c0_17 = arith.constant 0 : index
    %16 = vector.load %arg1[%c12, %c0_16, %c0_17] : memref<25x8x128xf32, #tpu.memory_space<vmem>>, vector<1x8x128xf32>
    %17 = vector.shape_cast %16 : vector<1x8x128xf32> to vector<8x128xf32>
    %18 = arith.maximumf %1, %3 : vector<8x128xf32>
    %19 = arith.maximumf %5, %7 : vector<8x128xf32>
    %20 = arith.maximumf %9, %11 : vector<8x128xf32>
    %21 = arith.maximumf %13, %15 : vector<8x128xf32>
    %22 = arith.maximumf %18, %19 : vector<8x128xf32>
    %23 = arith.maximumf %20, %21 : vector<8x128xf32>
    %24 = arith.maximumf %22, %23 : vector<8x128xf32>
    %25 = arith.maximumf %24, %17 : vector<8x128xf32>
    %c0_18 = arith.constant 0 : index
    %c0_19 = arith.constant 0 : index
    %c0_20 = arith.constant 0 : index
    %26 = vector.load %arg2[%c0_18, %c0_19, %c0_20] : memref<4x8x128xf32, #tpu.memory_space<vmem>>, vector<1x8x128xf32>
    %27 = vector.shape_cast %26 : vector<1x8x128xf32> to vector<8x128xf32>
    %28 = vector.shape_cast %25 : vector<8x128xf32> to vector<1x8x128xf32>
    tpu.vector_store %arg2[%c0_18, %c0_19, %c0_20], %28 {strides = array<i32>} : memref<4x8x128xf32, #tpu.memory_space<vmem>>, vector<1x8x128xf32>,
    %c3 = arith.constant 3 : index
    %c0_21 = arith.constant 0 : index
    %c0_22 = arith.constant 0 : index
    %29 = vector.load %arg1[%c3, %c0_21, %c0_22] : memref<25x8x128xf32, #tpu.memory_space<vmem>>, vector<1x8x128xf32>
    %30 = vector.shape_cast %29 : vector<1x8x128xf32> to vector<8x128xf32>
    %c4 = arith.constant 4 : index
    %c0_23 = arith.constant 0 : index
    %c0_24 = arith.constant 0 : index
    %31 = vector.load %arg1[%c4, %c0_23, %c0_24] : memref<25x8x128xf32, #tpu.memory_space<vmem>>, vector<1x8x128xf32>
    %32 = vector.shape_cast %31 : vector<1x8x128xf32> to vector<8x128xf32>
    %c8 = arith.constant 8 : index
    %c0_25 = arith.constant 0 : index
    %c0_26 = arith.constant 0 : index
    %33 = vector.load %arg1[%c8, %c0_25, %c0_26] : memref<25x8x128xf32, #tpu.memory_space<vmem>>, vector<1x8x128xf32>
    %34 = vector.shape_cast %33 : vector<1x8x128xf32> to vector<8x128xf32>
    %c9 = arith.constant 9 : index
    %c0_27 = arith.constant 0 : index
    %c0_28 = arith.constant 0 : index
    %35 = vector.load %arg1[%c9, %c0_27, %c0_28] : memref<25x8x128xf32, #tpu.memory_space<vmem>>, vector<1x8x128xf32>
    %36 = vector.shape_cast %35 : vector<1x8x128xf32> to vector<8x128xf32>
    %c13 = arith.constant 13 : index
    %c0_29 = arith.constant 0 : index
    %c0_30 = arith.constant 0 : index
    %37 = vector.load %arg1[%c13, %c0_29, %c0_30] : memref<25x8x128xf32, #tpu.memory_space<vmem>>, vector<1x8x128xf32>
    %38 = vector.shape_cast %37 : vector<1x8x128xf32> to vector<8x128xf32>
    %c14 = arith.constant 14 : index
    %c0_31 = arith.constant 0 : index
    %c0_32 = arith.constant 0 : index
    %39 = vector.load %arg1[%c14, %c0_31, %c0_32] : memref<25x8x128xf32, #tpu.memory_space<vmem>>, vector<1x8x128xf32>
    %40 = vector.shape_cast %39 : vector<1x8x128xf32> to vector<8x128xf32>
    %41 = arith.maximumf %30, %32 : vector<8x128xf32>
    %42 = arith.maximumf %34, %36 : vector<8x128xf32>
    %43 = arith.maximumf %38, %40 : vector<8x128xf32>
    %44 = arith.maximumf %41, %42 : vector<8x128xf32>
    %45 = arith.maximumf %44, %43 : vector<8x128xf32>
    %c1_33 = arith.constant 1 : index
    %c0_34 = arith.constant 0 : index
    %c0_35 = arith.constant 0 : index
    %46 = vector.load %arg2[%c1_33, %c0_34, %c0_35] : memref<4x8x128xf32, #tpu.memory_space<vmem>>, vector<1x8x128xf32>
    %47 = vector.shape_cast %46 : vector<1x8x128xf32> to vector<8x128xf32>
    %48 = vector.shape_cast %45 : vector<8x128xf32> to vector<1x8x128xf32>
    tpu.vector_store %arg2[%c1_33, %c0_34, %c0_35], %48 {strides = array<i32>} : memref<4x8x128xf32, #tpu.memory_space<vmem>>, vector<1x8x128xf32>,
    %c15 = arith.constant 15 : index
    %c0_36 = arith.constant 0 : index
    %c0_37 = arith.constant 0 : index
    %49 = vector.load %arg1[%c15, %c0_36, %c0_37] : memref<25x8x128xf32, #tpu.memory_space<vmem>>, vector<1x8x128xf32>
    %50 = vector.shape_cast %49 : vector<1x8x128xf32> to vector<8x128xf32>
    %c16 = arith.constant 16 : index
    %c0_38 = arith.constant 0 : index
    %c0_39 = arith.constant 0 : index
    %51 = vector.load %arg1[%c16, %c0_38, %c0_39] : memref<25x8x128xf32, #tpu.memory_space<vmem>>, vector<1x8x128xf32>
    %52 = vector.shape_cast %51 : vector<1x8x128xf32> to vector<8x128xf32>
    %c17 = arith.constant 17 : index
    %c0_40 = arith.constant 0 : index
    %c0_41 = arith.constant 0 : index
    %53 = vector.load %arg1[%c17, %c0_40, %c0_41] : memref<25x8x128xf32, #tpu.memory_space<vmem>>, vector<1x8x128xf32>
    %54 = vector.shape_cast %53 : vector<1x8x128xf32> to vector<8x128xf32>
    %c20 = arith.constant 20 : index
    %c0_42 = arith.constant 0 : index
    %c0_43 = arith.constant 0 : index
    %55 = vector.load %arg1[%c20, %c0_42, %c0_43] : memref<25x8x128xf32, #tpu.memory_space<vmem>>, vector<1x8x128xf32>
    %56 = vector.shape_cast %55 : vector<1x8x128xf32> to vector<8x128xf32>
    %c21 = arith.constant 21 : index
    %c0_44 = arith.constant 0 : index
    %c0_45 = arith.constant 0 : index
    %57 = vector.load %arg1[%c21, %c0_44, %c0_45] : memref<25x8x128xf32, #tpu.memory_space<vmem>>, vector<1x8x128xf32>
    %58 = vector.shape_cast %57 : vector<1x8x128xf32> to vector<8x128xf32>
    %c22 = arith.constant 22 : index
    %c0_46 = arith.constant 0 : index
    %c0_47 = arith.constant 0 : index
    %59 = vector.load %arg1[%c22, %c0_46, %c0_47] : memref<25x8x128xf32, #tpu.memory_space<vmem>>, vector<1x8x128xf32>
    %60 = vector.shape_cast %59 : vector<1x8x128xf32> to vector<8x128xf32>
    %61 = arith.maximumf %50, %52 : vector<8x128xf32>
    %62 = arith.maximumf %54, %56 : vector<8x128xf32>
    %63 = arith.maximumf %58, %60 : vector<8x128xf32>
    %64 = arith.maximumf %61, %62 : vector<8x128xf32>
    %65 = arith.maximumf %64, %63 : vector<8x128xf32>
    %c2_48 = arith.constant 2 : index
    %c0_49 = arith.constant 0 : index
    %c0_50 = arith.constant 0 : index
    %66 = vector.load %arg2[%c2_48, %c0_49, %c0_50] : memref<4x8x128xf32, #tpu.memory_space<vmem>>, vector<1x8x128xf32>
    %67 = vector.shape_cast %66 : vector<1x8x128xf32> to vector<8x128xf32>
    %68 = vector.shape_cast %65 : vector<8x128xf32> to vector<1x8x128xf32>
    tpu.vector_store %arg2[%c2_48, %c0_49, %c0_50], %68 {strides = array<i32>} : memref<4x8x128xf32, #tpu.memory_space<vmem>>, vector<1x8x128xf32>,
    %c18 = arith.constant 18 : index
    %c0_51 = arith.constant 0 : index
    %c0_52 = arith.constant 0 : index
    %69 = vector.load %arg1[%c18, %c0_51, %c0_52] : memref<25x8x128xf32, #tpu.memory_space<vmem>>, vector<1x8x128xf32>
    %70 = vector.shape_cast %69 : vector<1x8x128xf32> to vector<8x128xf32>
    %c19 = arith.constant 19 : index
    %c0_53 = arith.constant 0 : index
    %c0_54 = arith.constant 0 : index
    %71 = vector.load %arg1[%c19, %c0_53, %c0_54] : memref<25x8x128xf32, #tpu.memory_space<vmem>>, vector<1x8x128xf32>
    %72 = vector.shape_cast %71 : vector<1x8x128xf32> to vector<8x128xf32>
    %c23 = arith.constant 23 : index
    %c0_55 = arith.constant 0 : index
    %c0_56 = arith.constant 0 : index
    %73 = vector.load %arg1[%c23, %c0_55, %c0_56] : memref<25x8x128xf32, #tpu.memory_space<vmem>>, vector<1x8x128xf32>
    %74 = vector.shape_cast %73 : vector<1x8x128xf32> to vector<8x128xf32>
    %c24 = arith.constant 24 : index
    %c0_57 = arith.constant 0 : index
    %c0_58 = arith.constant 0 : index
    %75 = vector.load %arg1[%c24, %c0_57, %c0_58] : memref<25x8x128xf32, #tpu.memory_space<vmem>>, vector<1x8x128xf32>
    %76 = vector.shape_cast %75 : vector<1x8x128xf32> to vector<8x128xf32>
    %77 = arith.maximumf %70, %72 : vector<8x128xf32>
    %78 = arith.maximumf %74, %76 : vector<8x128xf32>
    %79 = arith.maximumf %77, %78 : vector<8x128xf32>
    %c3_59 = arith.constant 3 : index
    %c0_60 = arith.constant 0 : index
    %c0_61 = arith.constant 0 : index
    %80 = vector.load %arg2[%c3_59, %c0_60, %c0_61] : memref<4x8x128xf32, #tpu.memory_space<vmem>>, vector<1x8x128xf32>
    %81 = vector.shape_cast %80 : vector<1x8x128xf32> to vector<8x128xf32>
    %82 = vector.shape_cast %79 : vector<8x128xf32> to vector<1x8x128xf32>
    tpu.vector_store %arg2[%c3_59, %c0_60, %c0_61], %82 {strides = array<i32>} : memref<4x8x128xf32, #tpu.memory_space<vmem>>, vector<1x8x128xf32>,
    return
  }
  func.func @transform_0(%arg0: i32) -> (i32, i32, i32) {
    %c0_i32 = arith.constant 0 : i32
    %c0_i32_0 = arith.constant 0 : i32
    %c0_i32_1 = arith.constant 0 : i32
    return %c0_i32, %arg0, %c0_i32_0 : i32, i32, i32
  }
  func.func @transform_1(%arg0: i32) -> (i32, i32, i32) {
    %c0_i32 = arith.constant 0 : i32
    %c0_i32_0 = arith.constant 0 : i32
    %c0_i32_1 = arith.constant 0 : i32
    return %c0_i32, %arg0, %c0_i32_0 : i32, i32, i32
  }
}

</mosaic_0001>

<bundles_post_ra>
// kernel: tpu_custom_call.1
= control target key start
LH: loop header
LB: loop body
LE: loop exit
PB: predicated region body
PF: predicated region fallthrough
CT: control target
= control target key end

     0   :  { %6 = vsyncpa [#allocation3], 0  ;;  %s213_s0 = inlined_call_operand.hbm [shape: f32[25,8,128], index: 0, kind: input, shape index: {}]   ;;  %s214_s1 = inlined_call_operand.hbm [shape: f32[4,8,128], index: 1, kind: output, shape index: {}]  }
   0x1   :  { %7 = vsyncpa [#allocation4], 0  ;;  %s169_s6 = smov [#allocation2]   ;;  %s121_s10 = scalar_lea.hbm %s213_s0, 3200 }
   0x2   :  { %s13_s7 = sshll.u32 %s169_s6, 4  ;;  %p122_p0 = scmp.ne.s32.totalorder %s213_s0, %s121_s10  ;;  %s14_s7 = int_to_ptr.vmem [resolvable:$true] %s13_s7 }
   0x3   :  { %p125_p1 = scmp.lt.u32.totalorder %s121_s10, %s213_s0 }
   0x5   :  { %p127_p2 = pnand %p125_p1, %p122_p0 }
   0x7   :  { %130 = shalt.err (!%p127_p2)
}
   0x8   :  { %s131_s15 = scalar_lea.vmem %s14_s7, 3200  ;;  %p136_p4 = scmp.lt.s32.totalorder %s14_s7, %s14_s7 }
   0x9   :  { %p132_p3 = scmp.ne.s32.totalorder %s14_s7, %s131_s15  ;;  %p137_p5 = scmp.lt.s32.totalorder %s131_s15, %s131_s15 }
   0xb   :  { %p138_p6 = por %p137_p5, %p136_p4 }
   0xd   :  { %p139_p7 = pnand %p138_p6, %p132_p3 }
   0xf   :  { %142 = shalt.err (!%p139_p7)
}
  0x10   :  { %s170_s16 = smov 128   ;;  %s171_s17 = smov 8  }
  0x11   :  { %19 = dma.hbm_to_vmem [thread:$0]  %s213_s0, 3200, %s14_s7, [#allocation3], %s170_s16, %s170_s16, %s171_s17  }
  0x12   :  { %165 = dma.done.wait [#allocation3], 3200  }
  0x13   :  { %166 = vsyncadd [#allocation3], 4294964096  ;;  %v23_v0 = vld [vmem:[#allocation2] sm:$0xff]  ;;  %v25_v1 = vld [vmem:[#allocation2 + $0x8] sm:$0xff]  ;;  %s172_s0 = smov [#allocation5]  }
  0x14   :  { %v27_v2 = vld [vmem:[#allocation2 + $0x10] sm:$0xff]  ;;  %v29_v3 = vld [vmem:[#allocation2 + $0x28] sm:$0xff]  ;;  %v33_v5 = vld [vmem:[#allocation2 + $0x38] sm:$0xff]  ;;  %v40_v6 = vmax.f32 %v23_v0, %v25_v1  ;;  %s105_s20 = sshll.u32 %s172_s0, 4  ;;  %s106_s20 = int_to_ptr.vmem [resolvable:$true] %s105_s20 }
  0x15   :  { %v31_v4 = vld [vmem:[#allocation2 + $0x30] sm:$0xff]  ;;  %v37_v8 = vld [vmem:[#allocation2 + $0x58] sm:$0xff]  ;;  %v41_v9 = vmax.f32 %v27_v2, %v29_v3  ;;  %v52_v13 = vld [vmem:[#allocation2 + $0x20] sm:$0xff]  ;;  %s143_s21 = scalar_lea.vmem %s106_s20, 512  ;;  %p148_p9 = scmp.lt.s32.totalorder %s106_s20, %s106_s20 }
  0x16   :  { %v35_v7 = vld [vmem:[#allocation2 + $0x50] sm:$0xff]  ;;  %v42_v10 = vmax.f32 %v31_v4, %v33_v5  ;;  %v50_v12 = vld [vmem:[#allocation2 + $0x18] sm:$0xff]  ;;  %v54_v14 = vld [vmem:[#allocation2 + $0x40] sm:$0xff]  ;;  %p144_p8 = scmp.ne.s32.totalorder %s106_s20, %s143_s21  ;;  %p149_p10 = scmp.lt.s32.totalorder %s143_s21, %s143_s21 }
  0x17   :  { %v43_v11 = vmax.f32 %v35_v7, %v37_v8  ;;  %v39_v15 = vld [vmem:[#allocation2 + $0x60] sm:$0xff]  ;;  %v44_v16 = vmax.f32 %v40_v6, %v41_v9  ;;  %v56_v17 = vld [vmem:[#allocation2 + $0x48] sm:$0xff]  ;;  %v60_v19 = vld [vmem:[#allocation2 + $0x70] sm:$0xff]  ;;  %v61_v20 = vmax.f32 %v50_v12, %v52_v13 }
  0x18   :  { %v58_v18 = vld [vmem:[#allocation2 + $0x68] sm:$0xff]  ;;  %v62_v22 = vmax.f32 %v54_v14, %v56_v17  ;;  %v69_v24 = vld [vmem:[#allocation2 + $0x78] sm:$0xff]  ;;  %v71_v25 = vld [vmem:[#allocation2 + $0x80] sm:$0xff]  ;;  %p150_p11 = por %p149_p10, %p148_p9 }
  0x19   :  { %v45_v21 = vmax.f32 %v42_v10, %v43_v11  ;;  %v63_v23 = vmax.f32 %v58_v18, %v60_v19  ;;  %v73_v26 = vld [vmem:[#allocation2 + $0x88] sm:$0xff]  ;;  %v75_v27 = vld [vmem:[#allocation2 + $0xa0] sm:$0xff]  ;;  %v79_v29 = vld [vmem:[#allocation2 + $0xb0] sm:$0xff]  ;;  %v80_v30 = vmax.f32 %v69_v24, %v71_v25 }
  0x1a   :  { %v77_v28 = vld [vmem:[#allocation2 + $0xa8] sm:$0xff]  ;;  %v64_v32 = vmax.f32 %v61_v20, %v62_v22  ;;  %v81_v33 = vmax.f32 %v73_v26, %v75_v27  ;;  %v88_v35 = vld [vmem:[#allocation2 + $0x90] sm:$0xff]  ;;  %v90_v36 = vld [vmem:[#allocation2 + $0x98] sm:$0xff]  ;;  %p151_p12 = pnand %p150_p11, %p144_p8 }
  0x1b   :  { %v46_v31 = vmax.f32 %v44_v16, %v45_v21  ;;  %v82_v34 = vmax.f32 %v77_v28, %v79_v29  ;;  %v92_v37 = vld [vmem:[#allocation2 + $0xb8] sm:$0xff]  ;;  %v94_v38 = vld [vmem:[#allocation2 + $0xc0] sm:$0xff]  ;;  %v95_v39 = vmax.f32 %v88_v35, %v90_v36 }
  0x1c   :  { %v65_v41 = vmax.f32 %v64_v32, %v63_v23  ;;  %v83_v42 = vmax.f32 %v80_v30, %v81_v33  ;;  %v96_v43 = vmax.f32 %v92_v37, %v94_v38 }
  0x1d   :  { %v47_v40 = vmax.f32 %v46_v31, %v39_v15 }
  0x1e   :  { %67 = vst [vmem:[#allocation5 + $0x8] sm:$0xff] %v65_v41  ;;  %v84_v44 = vmax.f32 %v83_v42, %v82_v34  ;;  %v97_v45 = vmax.f32 %v95_v39, %v96_v43 }
  0x1f   :  { %48 = vst [vmem:[#allocation5] sm:$0xff] %v47_v40 }
  0x20   :  { %86 = vst [vmem:[#allocation5 + $0x10] sm:$0xff] %v84_v44  ;;  %99 = vst [vmem:[#allocation5 + $0x18] sm:$0xff] %v97_v45 }
  0x21   :  { %154 = shalt.err (!%p151_p12)
}
  0x22   :  { %s155_s24 = scalar_lea.hbm %s214_s1, 512 }
  0x23   :  { %p156_p13 = scmp.ne.s32.totalorder %s214_s1, %s155_s24  ;;  %p159_p0 = scmp.lt.u32.totalorder %s155_s24, %s214_s1 }
  0x25   :  { %p161_p1 = pnand %p159_p0, %p156_p13 }
  0x27   :  { %164 = shalt.err (!%p161_p1)
}
  0x28   :  { %111 = dma.vmem_to_hbm [thread:$0]  %s106_s20, 512, %s214_s1, [#allocation4], %s170_s16, %s170_s16, %s171_s17  }
  0x29   :  { %167 = dma.done.wait [#allocation4], 512  }
  0x2a   :  { %168 = vsyncadd [#allocation4], 4294966784 }
  0x2b   :  { %115 = vsyncpa [#allocation3], 1 }
  0x2c   :  { %116 = vsyncpa [#allocation4], 1 }

</bundles_post_ra>
